<compile_context>
chip_gen: v7x
topology: tpu7x:2x2x1
jax: 0.10.0
libtpu: 0.0.40
codegen_flags: <defaults>
</compile_context>

<pallas_src>
import jax
import jax.numpy as jnp
from jax.experimental import pallas as pl
from jax.experimental.pallas import tpu as pltpu

IN_C = 16
HID_C = 32
OUT_C = 8
LN_EPS = 1e-5
RESIDUAL = True

# Row ranges inside the packed (80, HID_C) weight block.
_W1_LO, _W1_HI = 0, IN_C                         # (16, 32)
_W2_LO, _W2_HI = IN_C, IN_C + HID_C              # (32, 32)
_W3_LO, _W3_HI = IN_C + HID_C, IN_C + 2 * HID_C  # (32, 32); only [:, :OUT_C] valid
# Row indices inside the packed (8, HID_C) vector block.
_B1, _G1, _BE1, _B2, _G2, _BE2, _B3 = range(7)


def _round_up(n, m):
    return ((n + m - 1) // m) * m


def _layernorm(h, gamma, beta, ones_col):
    # One-pass LayerNorm: var = E[x^2] - E[x]^2.  Row reductions run on the MXU
    # (dot against a ones column) instead of XLU cross-lane reduces.
    inv_c = 1.0 / h.shape[-1]
    mean = jnp.dot(h, ones_col, preferred_element_type=jnp.float32) * inv_c
    mean_sq = jnp.dot(h * h, ones_col, preferred_element_type=jnp.float32) * inv_c
    var = mean_sq - mean * mean
    return (h - mean) * jax.lax.rsqrt(var + LN_EPS) * gamma + beta


def mlp_kernel(x_ref, w_ref, v_ref, o_ref):
    x = x_ref[...].astype(jnp.float32)
    ones_col = jnp.ones((HID_C, 1), jnp.float32)

    w1 = w_ref[_W1_LO:_W1_HI, :]
    w2 = w_ref[_W2_LO:_W2_HI, :]
    w3 = w_ref[_W3_LO:_W3_HI, 0:OUT_C]

    b1 = v_ref[_B1:_B1 + 1, :]
    g1 = v_ref[_G1:_G1 + 1, :]
    be1 = v_ref[_BE1:_BE1 + 1, :]
    b2 = v_ref[_B2:_B2 + 1, :]
    g2 = v_ref[_G2:_G2 + 1, :]
    be2 = v_ref[_BE2:_BE2 + 1, :]
    b3 = v_ref[_B3:_B3 + 1, 0:OUT_C]

    # ---- layer 0: Linear(in, hidden) + ReLU + LayerNorm ----
    h = jnp.dot(x, w1, preferred_element_type=jnp.float32) + b1
    h = jnp.maximum(h, 0.0)
    h = _layernorm(h, g1, be1, ones_col)
    # residual skipped: (tm, IN_C) != (tm, HID_C)  [static decision]
    x_prev = h

    # ---- layer 1: Linear(hidden, hidden) + ReLU + LayerNorm + residual ----
    h2 = jnp.dot(h, w2, preferred_element_type=jnp.float32) + b2
    h2 = jnp.maximum(h2, 0.0)
    h2 = _layernorm(h2, g2, be2, ones_col)
    if RESIDUAL:  # shapes match (both hidden)
        h2 = h2 + x_prev

    # ---- final layer: Linear(hidden, out) ----
    out = jnp.dot(h2, w3, preferred_element_type=jnp.float32) + b3
    # residual skipped: (tm, HID_C) != (tm, OUT_C)

    o_ref[...] = out.astype(o_ref.dtype)


def _pack_params(params):
    (w1, b1, g1, be1, w2, b2, g2, be2, w3, b3) = params
    w3p = jnp.zeros((HID_C, HID_C), jnp.float32).at[:, :OUT_C].set(w3)
    w_pack = jnp.concatenate([w1, w2, w3p], axis=0).astype(jnp.float32)      # (80, 32)
    b3p = jnp.zeros((1, HID_C), jnp.float32).at[:, :OUT_C].set(b3)
    v_pack = jnp.concatenate(
        [b1, g1, be1, b2, g2, be2, b3p, jnp.zeros((1, HID_C), jnp.float32)],
        axis=0).astype(jnp.float32)                                          # (8, 32)
    return w_pack, v_pack


def mlp_forward(x, params, *, tm=1024, io_dtype=jnp.bfloat16):
    """Fused 3-layer MLP forward (eval mode).  x: (N, IN_C) -> (N, OUT_C) f32."""
    N, c = x.shape
    assert c == IN_C

    # Row tile: large enough to amortize the ~0.35us per-step overhead, capped
    # so the grid keeps >= 2 steps (both v7x TensorCores get work), multiple of
    # 16 for bf16 sublane packing.
    tm_eff = max(16, min(int(tm), _round_up(pl.cdiv(N, 2), 16)))
    n_pad = _round_up(N, tm_eff)

    x_in = x.astype(io_dtype)                 # bf16 I/O halves HBM read traffic
    if n_pad != N:
        x_in = jnp.pad(x_in, ((0, n_pad - N), (0, 0)))

    w_pack, v_pack = _pack_params(params)

    # Advisory cost hint: 3 matmuls + 2 LN-reduction matmuls per row.
    flops = 2 * n_pad * (IN_C * HID_C + HID_C * HID_C + HID_C * OUT_C
                         + 2 * HID_C)
    bytes_accessed = (n_pad * IN_C * x_in.dtype.itemsize
                      + n_pad * OUT_C * 4
                      + w_pack.size * 4 + v_pack.size * 4)
    cost = pl.CostEstimate(flops=flops, transcendentals=2 * n_pad,
                           bytes_accessed=bytes_accessed)

    out = pl.pallas_call(
        mlp_kernel,
        out_shape=jax.ShapeDtypeStruct((n_pad, OUT_C), jnp.float32),
        grid_spec=pltpu.PrefetchScalarGridSpec(
            num_scalar_prefetch=0,
            grid=(n_pad // tm_eff,),
            in_specs=[
                pl.BlockSpec((tm_eff, IN_C), lambda i: (i, 0)),   # streamed rows
                pl.BlockSpec(w_pack.shape, lambda i: (0, 0)),     # resident weights
                pl.BlockSpec(v_pack.shape, lambda i: (0, 0)),     # resident bias/LN
            ],
            out_specs=pl.BlockSpec((tm_eff, OUT_C), lambda i: (i, 0)),
        ),
        compiler_params=pltpu.CompilerParams(
            dimension_semantics=("parallel",)),
        cost_estimate=cost,
    )(x_in, w_pack, v_pack)

    return out[:N] if n_pad != N else out


def init_params(key):
    """Deterministic init mimicking nn.Linear (uniform(+/-1/sqrt(fan_in))) and
    nn.LayerNorm (gamma=1, beta=0).  Weights stored as (in, out)."""
    ks = jax.random.split(key, 6)

    def linear(kw, kb, fan_in, fan_out):
        bound = 1.0 / jnp.sqrt(fan_in)
        w = jax.random.uniform(kw, (fan_in, fan_out), jnp.float32, -bound, bound)
        b = jax.random.uniform(kb, (1, fan_out), jnp.float32, -bound, bound)
        return w, b

    w1, b1 = linear(ks[0], ks[1], IN_C, HID_C)
    w2, b2 = linear(ks[2], ks[3], HID_C, HID_C)
    w3, b3 = linear(ks[4], ks[5], HID_C, OUT_C)
    g1 = jnp.ones((1, HID_C), jnp.float32)
    be1 = jnp.zeros((1, HID_C), jnp.float32)
    g2 = jnp.ones((1, HID_C), jnp.float32)
    be2 = jnp.zeros((1, HID_C), jnp.float32)
    return (w1, b1, g1, be1, w2, b2, g2, be2, w3, b3)


def _layernorm_ref(h, gamma, beta):
    mean = jnp.mean(h, axis=-1, keepdims=True)
    var = jnp.mean((h - mean) ** 2, axis=-1, keepdims=True)
    return (h - mean) * jax.lax.rsqrt(var + LN_EPS) * gamma + beta


def mlp_reference(x, params):
    """Pure-JAX reference of the same eval-mode forward."""
    (w1, b1, g1, be1, w2, b2, g2, be2, w3, b3) = params
    h = jnp.maximum(x @ w1 + b1, 0.0)
    h = _layernorm_ref(h, g1, be1)
    x_prev = h
    h2 = jnp.maximum(h @ w2 + b2, 0.0)
    h2 = _layernorm_ref(h2, g2, be2)
    h2 = h2 + x_prev
    return h2 @ w3 + b3


if __name__ == "__main__":
    key = jax.random.PRNGKey(0)
    kx, kp = jax.random.split(key)

    N = 200  # deliberately NOT a multiple of the tile: exercises the ragged-N path
    x = jax.random.normal(kx, (N, IN_C), jnp.float32)
    params = init_params(kp)

    out = jax.block_until_ready(mlp_forward(x, params))

    # Reference consumes the same bf16-quantized input the kernel sees.
    x_q = x.astype(jnp.bfloat16).astype(jnp.float32)
    ref = mlp_reference(x_q, params)

    assert out.shape == (N, OUT_C)
    assert jnp.allclose(out, ref, atol=2e-3, rtol=2e-3), "mismatch vs reference"

    print("KERNEL_OK")
</pallas_src>

<mosaic_0001>
module attributes {stable_mosaic.version = 11 : i64} {
  func.func @mlp_kernel(%arg0: i32, %arg1: memref<112x16xbf16, #tpu.memory_space<vmem>>, %arg2: memref<80x32xf32, #tpu.memory_space<vmem>>, %arg3: memref<8x32xf32, #tpu.memory_space<vmem>>, %arg4: memref<112x8xf32, #tpu.memory_space<vmem>>) attributes {dimension_semantics = [#tpu.dimension_semantics<parallel>], iteration_bounds = array<i64: 2>, scalar_prefetch = 0 : i64, scratch_operands = 0 : i64, tpu.core_type = #tpu.core_type<tc>, window_params = [{transform_indices = @transform_0, window_bounds = array<i64: 112, 16>}, {pipeline_mode = #tpu.pipeline_mode<synchronous>, transform_indices = @transform_1, window_bounds = array<i64: 80, 32>}, {pipeline_mode = #tpu.pipeline_mode<synchronous>, transform_indices = @transform_2, window_bounds = array<i64: 8, 32>}, {transform_indices = @transform_3, window_bounds = array<i64: 112, 8>}]} {
    %c0 = arith.constant 0 : index
    %c0_0 = arith.constant 0 : index
    %0 = vector.load %arg1[%c0, %c0_0] : memref<112x16xbf16, #tpu.memory_space<vmem>>, vector<112x16xbf16>
    %1 = arith.extf %0 : vector<112x16xbf16> to vector<112x16xf32>
    %cst = arith.constant 1.000000e+00 : f32
    %2 = vector.broadcast %cst : f32 to vector<32x1xf32>
    %c0_1 = arith.constant 0 : index
    %c0_2 = arith.constant 0 : index
    %3 = vector.load %arg2[%c0_1, %c0_2] : memref<80x32xf32, #tpu.memory_space<vmem>>, vector<16x32xf32>
    %c16 = arith.constant 16 : index
    %c0_3 = arith.constant 0 : index
    %4 = vector.load %arg2[%c16, %c0_3] : memref<80x32xf32, #tpu.memory_space<vmem>>, vector<32x32xf32>
    %c48 = arith.constant 48 : index
    %c0_4 = arith.constant 0 : index
    %5 = vector.load %arg2[%c48, %c0_4] : memref<80x32xf32, #tpu.memory_space<vmem>>, vector<32x8xf32>
    %c0_5 = arith.constant 0 : index
    %c0_6 = arith.constant 0 : index
    %6 = vector.load %arg3[%c0_5, %c0_6] : memref<8x32xf32, #tpu.memory_space<vmem>>, vector<1x32xf32>
    %c1 = arith.constant 1 : index
    %c0_7 = arith.constant 0 : index
    %7 = vector.load %arg3[%c1, %c0_7] : memref<8x32xf32, #tpu.memory_space<vmem>>, vector<1x32xf32>
    %c2 = arith.constant 2 : index
    %c0_8 = arith.constant 0 : index
    %8 = vector.load %arg3[%c2, %c0_8] : memref<8x32xf32, #tpu.memory_space<vmem>>, vector<1x32xf32>
    %c3 = arith.constant 3 : index
    %c0_9 = arith.constant 0 : index
    %9 = vector.load %arg3[%c3, %c0_9] : memref<8x32xf32, #tpu.memory_space<vmem>>, vector<1x32xf32>
    %c4 = arith.constant 4 : index
    %c0_10 = arith.constant 0 : index
    %10 = vector.load %arg3[%c4, %c0_10] : memref<8x32xf32, #tpu.memory_space<vmem>>, vector<1x32xf32>
    %c5 = arith.constant 5 : index
    %c0_11 = arith.constant 0 : index
    %11 = vector.load %arg3[%c5, %c0_11] : memref<8x32xf32, #tpu.memory_space<vmem>>, vector<1x32xf32>
    %c6 = arith.constant 6 : index
    %c0_12 = arith.constant 0 : index
    %12 = vector.load %arg3[%c6, %c0_12] : memref<8x32xf32, #tpu.memory_space<vmem>>, vector<1x8xf32>
    %cst_13 = arith.constant dense<0.000000e+00> : vector<112x32xf32>
    %13 = tpu.matmul %1, %3, %cst_13 {dimension_numbers = #tpu.dot_dimension_numbers<[1], [0], [0], [1], [0, 0, 1, 1], [], []>} : vector<112x16xf32>, vector<16x32xf32>, vector<112x32xf32> -> vector<112x32xf32>
    %14 = vector.broadcast %6 : vector<1x32xf32> to vector<112x32xf32>
    %15 = arith.addf %13, %14 : vector<112x32xf32>
    %cst_14 = arith.constant 0.000000e+00 : f32
    %16 = vector.broadcast %cst_14 : f32 to vector<112x32xf32>
    %17 = arith.maximumf %15, %16 : vector<112x32xf32>
    %cst_15 = arith.constant dense<0.000000e+00> : vector<112x1xf32>
    %18 = tpu.matmul %17, %2, %cst_15 {dimension_numbers = #tpu.dot_dimension_numbers<[1], [0], [0], [1], [0, 0, 1, 1], [], []>} : vector<112x32xf32>, vector<32x1xf32>, vector<112x1xf32> -> vector<112x1xf32>
    %cst_16 = arith.constant 3.125000e-02 : f32
    %19 = vector.broadcast %cst_16 : f32 to vector<112x1xf32>
    %20 = arith.mulf %18, %19 : vector<112x1xf32>
    %21 = arith.mulf %17, %17 : vector<112x32xf32>
    %cst_17 = arith.constant dense<0.000000e+00> : vector<112x1xf32>
    %22 = tpu.matmul %21, %2, %cst_17 {dimension_numbers = #tpu.dot_dimension_numbers<[1], [0], [0], [1], [0, 0, 1, 1], [], []>} : vector<112x32xf32>, vector<32x1xf32>, vector<112x1xf32> -> vector<112x1xf32>
    %cst_18 = arith.constant 3.125000e-02 : f32
    %23 = vector.broadcast %cst_18 : f32 to vector<112x1xf32>
    %24 = arith.mulf %22, %23 : vector<112x1xf32>
    %25 = arith.mulf %20, %20 : vector<112x1xf32>
    %26 = arith.subf %24, %25 : vector<112x1xf32>
    %27 = vector.broadcast %20 : vector<112x1xf32> to vector<112x32xf32>
    %28 = arith.subf %17, %27 : vector<112x32xf32>
    %cst_19 = arith.constant 9.99999974E-6 : f32
    %29 = vector.broadcast %cst_19 : f32 to vector<112x1xf32>
    %30 = arith.addf %26, %29 : vector<112x1xf32>
    %31 = math.rsqrt %30 : vector<112x1xf32>
    %32 = vector.broadcast %31 : vector<112x1xf32> to vector<112x32xf32>
    %33 = arith.mulf %28, %32 : vector<112x32xf32>
    %34 = vector.broadcast %7 : vector<1x32xf32> to vector<112x32xf32>
    %35 = arith.mulf %33, %34 : vector<112x32xf32>
    %36 = vector.broadcast %8 : vector<1x32xf32> to vector<112x32xf32>
    %37 = arith.addf %35, %36 : vector<112x32xf32>
    %cst_20 = arith.constant dense<0.000000e+00> : vector<112x32xf32>
    %38 = tpu.matmul %37, %4, %cst_20 {dimension_numbers = #tpu.dot_dimension_numbers<[1], [0], [0], [1], [0, 0, 1, 1], [], []>} : vector<112x32xf32>, vector<32x32xf32>, vector<112x32xf32> -> vector<112x32xf32>
    %39 = vector.broadcast %9 : vector<1x32xf32> to vector<112x32xf32>
    %40 = arith.addf %38, %39 : vector<112x32xf32>
    %cst_21 = arith.constant 0.000000e+00 : f32
    %41 = vector.broadcast %cst_21 : f32 to vector<112x32xf32>
    %42 = arith.maximumf %40, %41 : vector<112x32xf32>
    %cst_22 = arith.constant dense<0.000000e+00> : vector<112x1xf32>
    %43 = tpu.matmul %42, %2, %cst_22 {dimension_numbers = #tpu.dot_dimension_numbers<[1], [0], [0], [1], [0, 0, 1, 1], [], []>} : vector<112x32xf32>, vector<32x1xf32>, vector<112x1xf32> -> vector<112x1xf32>
    %cst_23 = arith.constant 3.125000e-02 : f32
    %44 = vector.broadcast %cst_23 : f32 to vector<112x1xf32>
    %45 = arith.mulf %43, %44 : vector<112x1xf32>
    %46 = arith.mulf %42, %42 : vector<112x32xf32>
    %cst_24 = arith.constant dense<0.000000e+00> : vector<112x1xf32>
    %47 = tpu.matmul %46, %2, %cst_24 {dimension_numbers = #tpu.dot_dimension_numbers<[1], [0], [0], [1], [0, 0, 1, 1], [], []>} : vector<112x32xf32>, vector<32x1xf32>, vector<112x1xf32> -> vector<112x1xf32>
    %cst_25 = arith.constant 3.125000e-02 : f32
    %48 = vector.broadcast %cst_25 : f32 to vector<112x1xf32>
    %49 = arith.mulf %47, %48 : vector<112x1xf32>
    %50 = arith.mulf %45, %45 : vector<112x1xf32>
    %51 = arith.subf %49, %50 : vector<112x1xf32>
    %52 = vector.broadcast %45 : vector<112x1xf32> to vector<112x32xf32>
    %53 = arith.subf %42, %52 : vector<112x32xf32>
    %cst_26 = arith.constant 9.99999974E-6 : f32
    %54 = vector.broadcast %cst_26 : f32 to vector<112x1xf32>
    %55 = arith.addf %51, %54 : vector<112x1xf32>
    %56 = math.rsqrt %55 : vector<112x1xf32>
    %57 = vector.broadcast %56 : vector<112x1xf32> to vector<112x32xf32>
    %58 = arith.mulf %53, %57 : vector<112x32xf32>
    %59 = vector.broadcast %10 : vector<1x32xf32> to vector<112x32xf32>
    %60 = arith.mulf %58, %59 : vector<112x32xf32>
    %61 = vector.broadcast %11 : vector<1x32xf32> to vector<112x32xf32>
    %62 = arith.addf %60, %61 : vector<112x32xf32>
    %63 = arith.addf %62, %37 : vector<112x32xf32>
    %cst_27 = arith.constant dense<0.000000e+00> : vector<112x8xf32>
    %64 = tpu.matmul %63, %5, %cst_27 {dimension_numbers = #tpu.dot_dimension_numbers<[1], [0], [0], [1], [0, 0, 1, 1], [], []>} : vector<112x32xf32>, vector<32x8xf32>, vector<112x8xf32> -> vector<112x8xf32>
    %65 = vector.broadcast %12 : vector<1x8xf32> to vector<112x8xf32>
    %66 = arith.addf %64, %65 : vector<112x8xf32>
    %c0_28 = arith.constant 0 : index
    %c0_29 = arith.constant 0 : index
    %67 = vector.load %arg4[%c0_28, %c0_29] : memref<112x8xf32, #tpu.memory_space<vmem>>, vector<112x8xf32>
    tpu.vector_store %arg4[%c0_28, %c0_29], %66 {strides = array<i32>} : memref<112x8xf32, #tpu.memory_space<vmem>>, vector<112x8xf32>,
    return
  }
  func.func @transform_0(%arg0: i32) -> (i32, i32) {
    %c0_i32 = arith.constant 0 : i32
    %c0_i32_0 = arith.constant 0 : i32
    return %arg0, %c0_i32 : i32, i32
  }
  func.func @transform_1(%arg0: i32) -> (i32, i32) {
    %c0_i32 = arith.constant 0 : i32
    %c0_i32_0 = arith.constant 0 : i32
    %c0_i32_1 = arith.constant 0 : i32
    return %c0_i32, %c0_i32_0 : i32, i32
  }
  func.func @transform_2(%arg0: i32) -> (i32, i32) {
    %c0_i32 = arith.constant 0 : i32
    %c0_i32_0 = arith.constant 0 : i32
    %c0_i32_1 = arith.constant 0 : i32
    return %c0_i32, %c0_i32_0 : i32, i32
  }
  func.func @transform_3(%arg0: i32) -> (i32, i32) {
    %c0_i32 = arith.constant 0 : i32
    %c0_i32_0 = arith.constant 0 : i32
    return %arg0, %c0_i32 : i32, i32
  }
}

</mosaic_0001>

<bundles_post_ra>
// kernel: tpu_custom_call.1
= control target key start
LH: loop header
LB: loop body
LE: loop exit
PB: predicated region body
PF: predicated region fallthrough
CT: control target
= control target key end

     0   :  { %s2796_s12 = smov 0   ;;  %s3359_s0 = inlined_call_operand.vmem [shape: bf16[224,16], index: 0, kind: input, shape index: {}]   ;;  %s3360_s1 = inlined_call_operand.vmem [shape: f32[80,32], index: 1, kind: input, shape index: {}]   ;;  %s3361_s2 = inlined_call_operand.vmem [shape: f32[8,32], index: 2, kind: input, shape index: {}]   ;;  %s3362_s3 = inlined_call_operand.vmem [shape: f32[224,8], index: 3, kind: output, shape index: {}]  }
   0x1 LB: > { %s2189_s13 = sadd.s32 4294967295, %s2772_s12   ;;  %p2193_p0 = scmp.ge.s32.totalorder %s2772_s12, 1  ;;  %s2772_s12 = sphi %s2796_s12, %s13_s12  }
   0x2   : > { %p138_p1 = scmp.lt.s32.totalorder %s2772_s12, 3 }
   0x4   : > { %p139_p2 = pnand %p2193_p0, %p138_p1 }
   0x5   : > { %v202_v0 = vld [vmem:[%s3360_s1] sm:$0xff] (!%p139_p2)  ;;  %v203_v1 = vld [vmem:[%s3360_s1 + $0x8] sm:$0xff] (!%p139_p2)  ;;  %s162_s18 = smul.u32 (!%p139_p2), 14, %s2189_s13  ;;  %v2774_v3 = vmov (!%p139_p2), 1.0|1.0   ;;  %vm223_vm0 = vcmask (!%p139_p2), 130048  }
   0x6   : > { %142 = sbr.rel (%p139_p2) target bundleno = 1456 (0x5b0), region = 32  ;;  %v2660_v2 = vpack.c.bf16 (!%p139_p2), %v203_v1, %v202_v0  ;;  %v2842_v25 = vld [vmem:[%s3361_s2] ss:$0 sm:$0xff] (!%p139_p2)  ;;  %vm415_vm1 = vcmask (!%p139_p2), 261120   ;;  %vm2118_vm2 = vcmask (!%p139_p2), 64512  }
   0x7   : > { %p163_p3 = scmp.lt.s32.totalorder (!%p139_p2), %s162_s18, 27 }
   0x8   : > { %2661 = vmatprep.subr.bf16.mxu0 (!%p139_p2), %v2660_v2  ;;  %2696 = vmatprep.subr.bf16.mxu1 (!%p139_p2), %v2660_v2 }
   0x9   : > { %2663 = vmatpush3.bf16.msra.mxu0 (!%p139_p2), %v2660_v2  ;;  %2697 = vmatpush3.bf16.msra.mxu1 (!%p139_p2), %v2660_v2 }
   0xa   : > { %2664 = vmatprep.subr.bf16.mxu1 (!%p139_p2), %v2774_v3  ;;  %2668 = vmatprep.subr.bf16.mxu0 (!%p139_p2), %v2774_v3 }
   0xd   : > { %s3364_s18 = smov (!%p163_p3, %s162_s18), 27 }
   0xe   : > { %s2194_s19 = sshll.u32 %s3364_s18, 2  ;;  %s2195_s26 = sshll.u32 %s3364_s18, 3 }
   0xf   : > { %s166_s22 = scalar_lea.vmem %s3359_s0, %s2194_s19  ;;  %s3326_s4 = scalar_lea.vmem %s3362_s3, %s2195_s26 }
  0x10   : > { %v2304_v4 = vld [vmem:[%s166_s22] sm:$0xff]   ;;  %v2331_v5 = vld [vmem:[%s166_s22 + $0x8] sm:$0xff]   ;;  %v2332_v11 = vld [vmem:[%s166_s22 + $0x10] sm:$0xff]  }
  0x11   : > { %v2305_v6 = vunpack.c.l.bf16 %v2304_v4  ;;  %v2306_v7 = vunpack.c.h.bf16 %v2304_v4  ;;  %v2309_v8 = vunpack.c.l.bf16 %v2331_v5  ;;  %v2334_v9 = vld [vmem:[%s166_s22 + $0x20] sm:$0xff]   ;;  %v2335_v10 = vld [vmem:[%s166_s22 + $0x28] sm:$0xff]   ;;  %v2310_v15 = vunpack.c.h.bf16 %v2331_v5  ;;  %v2336_v16 = vld [vmem:[%s166_s22 + $0x30] sm:$0xff]  }
  0x12   : > { %v2321_v12 = vunpack.c.l.bf16 %v2334_v9  ;;  %v2322_v13 = vunpack.c.h.bf16 %v2334_v9  ;;  %v2325_v14 = vunpack.c.l.bf16 %v2335_v10  ;;  %v2313_v17 = vunpack.c.l.bf16 %v2332_v11  ;;  %v2333_v18 = vld [vmem:[%s166_s22 + $0x18] sm:$0xff]  }
  0x13   : > { %2465 = vmatprep.mubr.msk.f32.mxu0 %vm223_vm0, %v2305_v6  ;;  %v2326_v19 = vunpack.c.h.bf16 %v2335_v10  ;;  %v2329_v20 = vunpack.c.l.bf16 %v2336_v16  ;;  %v2314_v21 = vunpack.c.h.bf16 %v2332_v11  ;;  %v2317_v22 = vunpack.c.l.bf16 %v2333_v18 }
  0x14   : > { %2466 = vmatmul.mubr.msk.f32.vlgmr.msra.gmra.mrb[0].mxu0 %vm223_vm0, %v2306_v7  ;;  %2477 = vmatprep.mubr.msk.f32.mxu1 %vm223_vm0, %v2321_v12  ;;  %v2330_v23 = vunpack.c.h.bf16 %v2336_v16  ;;  %v2318_v24 = vunpack.c.h.bf16 %v2333_v18 }
  0x15   : > { %2468 = vmatprep.mubr.msk.f32.mxu0 %vm223_vm0, %v2309_v8  ;;  %2478 = vmatmul.mubr.msk.f32.vlgmr.msra.gmra.mrb[0].mxu1 %vm223_vm0, %v2322_v13 }
  0x16   : > { %2669 = vmatpush3.bf16.msra.mxu0 %v2774_v3  ;;  %2480 = vmatprep.mubr.msk.f32.mxu1 %vm223_vm0, %v2325_v14 }
  0x17   : > { %2665 = vmatpush3.bf16.msra.mxu1 %v2774_v3  ;;  %2670 = vmatprep.subr.bf16.mxu0 %v2774_v3 }
  0x18   : > { %2469 = vmatmul.mubr.msk.f32.gmra.mrb[2].mxu0 %vm223_vm0, %v2310_v15  ;;  %2666 = vmatprep.subr.bf16.mxu1 %v2774_v3 }
  0x19   : > { %2471 = vmatprep.mubr.msk.f32.mxu0 %vm223_vm0, %v2313_v17  ;;  %2481 = vmatmul.mubr.msk.f32.gmra.mrb[2].mxu1 %vm223_vm0, %v2326_v19  ;;  %v2775_v19 = vmov 0  }
  0x1a   : > { %2671 = vmatpush3.bf16.msra.mxu0 %v2774_v3  ;;  %2483 = vmatprep.mubr.msk.f32.mxu1 %vm223_vm0, %v2329_v20 }
  0x1b   : > { %2667 = vmatpush3.bf16.msra.mxu1 %v2774_v3  ;;  %2680 = vmatprep.subr.bf16.mxu0 %v2774_v3 }
  0x1c   : > { %2472 = vmatmul.mubr.msk.f32.gmra.mrb[4].mxu0 %vm223_vm0, %v2314_v21  ;;  %2708 = vset.pattern.permute.xlu0 %v2775_v19 }
  0x1d   : > { %2474 = vmatprep.mubr.msk.f32.mxu0 %vm223_vm0, %v2317_v22  ;;  %2484 = vmatmul.mubr.msk.f32.gmra.mrb[4].mxu1 %vm223_vm0, %v2330_v23 }
  0x1e   : > { %2709 = vset.pattern.permute.xlu1 %v2775_v19 }
  0x20   : > { %2475 = vmatmul.mubr.msk.f32.gmra.mrb[6].mxu0 %vm223_vm0, %v2318_v24 }
  0xe7   : > { %v2467_v26 = vpop.f32.mrb[0].mxu0 }
  0xe8   : > { %v338_v27 = vadd.f32 %v2467_v26, %v2842_v25  ;;  %v332_v28 = vpop.f32.mrb[1].mxu0  ;;  %v2479_v30 = vpop.f32.mrb[0].mxu1 }
  0xe9   : > { %v333_v29 = vadd.f32 %v2842_v25, %v332_v28  ;;  %v372_v32 = vpop.f32.mrb[1].mxu1  ;;  %v378_v0 = vadd.f32 %v2479_v30, %v2842_v25 }
  0xea   : > { %v2846_v31 = vmax.f32 %v338_v27, 0.0  ;;  %v373_v49 = vadd.f32 %v2842_v25, %v372_v32 }
  0xeb   : > { %v2848_v33 = vmax.f32 %v333_v29, 0.0  ;;  %v2470_v34 = vpop.f32.mrb[2].mxu0  ;;  %v2918_v9 = vmax.f32 %v378_v0, 0.0 }
  0xec   : > { %v348_v35 = vadd.f32 %v2470_v34, %v2842_v25  ;;  %v342_v36 = vpop.f32.mrb[3].mxu0  ;;  %v2482_v39 = vpop.f32.mrb[2].mxu1  ;;  %v608_v40 = vmul.f32 %v2846_v31, %v2846_v31  ;;  %v2891_v60 = vmax.f32 %v373_v49, 0.0 }
  0xed   : > { %v607_v37 = vmul.f32 %v2848_v33, %v2848_v33  ;;  %v343_v38 = vadd.f32 %v2842_v25, %v342_v36  ;;  %2494 = vmatprep.mubr.msk.f32.mxu1 %vm415_vm1, %v2848_v33  ;;  %v382_v42 = vpop.f32.mrb[3].mxu1  ;;  %v388_v2 = vadd.f32 %v2482_v39, %v2842_v25  ;;  %v616_v14 = vmul.f32 %v2918_v9, %v2918_v9 }
  0xee   : > { %v2858_v41 = vmax.f32 %v348_v35, 0.0  ;;  %2495 = vmatmul.mubr.msk.f32.vlgmr.msra.gmra.mrb[6].mxu1 %vm415_vm1, %v2846_v31  ;;  %v383_v61 = vadd.f32 %v2842_v25, %v382_v42  ;;  %v615_v5 = vmul.f32 %v2891_v60, %v2891_v60 }
  0xef   : > { %v2862_v43 = vmax.f32 %v343_v38, 0.0  ;;  %v2473_v44 = vpop.f32.mrb[4].mxu0  ;;  %2523 = vmatprep.mubr.msk.f32.mxu0 %vm415_vm1, %v607_v37  ;;  %v2926_v10 = vmax.f32 %v388_v2, 0.0 }
  0xf0   : > { %v358_v45 = vadd.f32 %v2473_v44, %v2842_v25  ;;  %v352_v46 = vpop.f32.mrb[5].mxu0  ;;  %2524 = vmatmul.mubr.msk.f32.vlgmr.msra.gmra.mrb[8].mxu0 %vm415_vm1, %v608_v40  ;;  %v2485_v50 = vpop.f32.mrb[4].mxu1  ;;  %v610_v51 = vmul.f32 %v2858_v41, %v2858_v41  ;;  %v2913_v6 = vmax.f32 %v383_v61, 0.0  ;;  %v204_v61 = vld [vmem:[%s3360_s1 + $0x10] sm:$0xff] }
  0xf1   : > { %v609_v47 = vmul.f32 %v2862_v43, %v2862_v43  ;;  %v353_v48 = vadd.f32 %v2842_v25, %v352_v46  ;;  %2497 = vmatprep.mubr.msk.f32.mxu1 %vm415_vm1, %v2862_v43  ;;  %2681 = vmatpush3.bf16.msra.mxu0 %v2774_v3  ;;  %v392_v53 = vpop.f32.mrb[5].mxu1  ;;  %v398_v11 = vadd.f32 %v2485_v50, %v2842_v25 }
  0xf2   : > { %v2876_v52 = vmax.f32 %v358_v45, 0.0  ;;  %2498 = vmatmul.mubr.msk.f32.gmra.mrb[8].mxu1 %vm415_vm1, %v2858_v41  ;;  %2682 = vmatprep.subr.bf16.mxu0 %v2774_v3  ;;  %v393_v7 = vadd.f32 %v2842_v25, %v392_v53  ;;  %v617_v12 = vmul.f32 %v2913_v6, %v2913_v6  ;;  %v618_v15 = vmul.f32 %v2926_v10, %v2926_v10 }
  0xf3   : > { %v2881_v54 = vmax.f32 %v353_v48, 0.0  ;;  %v2476_v55 = vpop.f32.mrb[6].mxu0  ;;  %2526 = vmatprep.mubr.msk.f32.mxu0 %vm415_vm1, %v609_v47  ;;  %v2943_v16 = vmax.f32 %v398_v11, 0.0 }
  0xf4   : > { %v368_v56 = vadd.f32 %v2476_v55, %v2842_v25  ;;  %v362_v57 = vpop.f32.mrb[7].mxu0  ;;  %2527 = vmatmul.mubr.msk.f32.gmra.mrb[10].mxu0 %vm415_vm1, %v610_v51  ;;  %v612_v62 = vmul.f32 %v2876_v52, %v2876_v52  ;;  %v2932_v13 = vmax.f32 %v393_v7, 0.0 }
  0xf5   : > { %v611_v58 = vmul.f32 %v2881_v54, %v2881_v54  ;;  %v363_v59 = vadd.f32 %v2842_v25, %v362_v57  ;;  %2500 = vmatprep.mubr.msk.f32.mxu1 %vm415_vm1, %v2881_v54  ;;  %2683 = vmatpush3.bf16.msra.mxu0 %v2774_v3  ;;  %v620_v18 = vmul.f32 %v2943_v16, %v2943_v16 }
  0xf6   : > { %v2897_v63 = vmax.f32 %v368_v56, 0.0  ;;  %2501 = vmatmul.mubr.msk.f32.gmra.mrb[10].mxu1 %vm415_vm1, %v2876_v52  ;;  %v619_v17 = vmul.f32 %v2932_v13, %v2932_v13 }
  0xf7   : > { %v2902_v1 = vmax.f32 %v363_v59, 0.0  ;;  %2529 = vmatprep.mubr.msk.f32.mxu0 %vm415_vm1, %v611_v58 }
  0xf8   : > { %2530 = vmatmul.mubr.msk.f32.gmra.mrb[12].mxu0 %vm415_vm1, %v612_v62  ;;  %v614_v8 = vmul.f32 %v2897_v63, %v2897_v63  ;;  %v205_v62 = vld [vmem:[%s3360_s1 + $0x18] sm:$0xff] }
  0xf9   : > { %v613_v4 = vmul.f32 %v2902_v1, %v2902_v1  ;;  %2503 = vmatprep.mubr.msk.f32.mxu1 %vm415_vm1, %v2902_v1 }
  0xfa   : > { %2504 = vmatmul.mubr.msk.f32.gmra.mrb[12].mxu1 %vm415_vm1, %v2897_v63 }
  0xfb   : > { %2532 = vmatprep.mubr.msk.f32.mxu0 %vm415_vm1, %v613_v4  ;;  %2506 = vmatprep.mubr.msk.f32.mxu1 %vm415_vm1, %v2891_v60 }
  0xfc   : > { %2533 = vmatmul.mubr.msk.f32.gmra.mrb[14].mxu0 %vm415_vm1, %v614_v8 }
  0xfd   : > { %2535 = vmatprep.mubr.msk.f32.mxu0 %vm415_vm1, %v615_v5  ;;  %v2672_v5 = vpack.c.bf16 %v205_v62, %v204_v61 }
  0xfe   : > { %2507 = vmatmul.mubr.msk.f32.gmra.mrb[14].mxu1 %vm415_vm1, %v2918_v9 }
  0xff   : > { %2509 = vmatprep.mubr.msk.f32.mxu1 %vm415_vm1, %v2913_v6  ;;  %2673 = vmatprep.subr.bf16.mxu1 %v2672_v5 }
 0x100   : > { %2536 = vmatmul.mubr.msk.f32.gmra.mrb[16].mxu0 %vm415_vm1, %v616_v14  ;;  %2675 = vmatpush3.bf16.msra.mxu1 %v2672_v5 }
 0x101   : > { %2538 = vmatprep.mubr.msk.f32.mxu0 %vm415_vm1, %v617_v12 }
 0x102   : > { %2510 = vmatmul.mubr.msk.f32.gmra.mrb[16].mxu1 %vm415_vm1, %v2926_v10 }
 0x103   : > { %2512 = vmatprep.mubr.msk.f32.mxu1 %vm415_vm1, %v2932_v13 }
 0x104   : > { %2539 = vmatmul.mubr.msk.f32.gmra.mrb[18].mxu0 %vm415_vm1, %v618_v15 }
 0x105   : > { %2541 = vmatprep.mubr.msk.f32.mxu0 %vm415_vm1, %v619_v17 }
 0x106   : > { %2513 = vmatmul.mubr.msk.f32.gmra.mrb[18].mxu1 %vm415_vm1, %v2943_v16 }
 0x108   : > { %2542 = vmatmul.mubr.msk.f32.gmra.mrb[20].mxu0 %vm415_vm1, %v620_v18 }
 0x1c1   : > { %v2496_v20 = vpop.f32.mrb[6].mxu1 }
 0x1c2   : > { %v594_v21 = vmul.f32 0.03125, %v2496_v20  ;;  %v524_v22 = vpop.f32.mrb[7].mxu1 }
 0x1c3   : > { %v593_v23 = vmul.f32 0.03125, %v524_v22  ;;  %v2525_v24 = vpop.f32.mrb[8].mxu0 }
 0x1c4   : > { %v813_v25 = vmul.f32 %v594_v21, %v594_v21  ;;  %v799_v26 = vmul.f32 0.03125, %v2525_v24  ;;  %v729_v27 = vpop.f32.mrb[9].mxu0  ;;  %847 = vperm.xlu0 %2708, %v594_v21  }
 0x1c5   : > { %v812_v28 = vmul.f32 %v593_v23, %v593_v23  ;;  %v798_v29 = vmul.f32 0.03125, %v729_v27  ;;  %v2499_v30 = vpop.f32.mrb[8].mxu1 }
 0x1c6   : > { %v827_v32 = vsub.f32 %v799_v26, %v813_v25  ;;  %v596_v34 = vmul.f32 0.03125, %v2499_v30  ;;  %v534_v35 = vpop.f32.mrb[9].mxu1 }
 0x1c7   : > { %v826_v36 = vsub.f32 %v798_v29, %v812_v28  ;;  %v595_v37 = vmul.f32 0.03125, %v534_v35  ;;  %v2528_v38 = vpop.f32.mrb[10].mxu0 }
 0x1c8   : > { %v815_v39 = vmul.f32 %v596_v34, %v596_v34  ;;  %v801_v40 = vmul.f32 0.03125, %v2528_v38  ;;  %v739_v42 = vpop.f32.mrb[11].mxu0  ;;  %842 = vperm.xlu0 %2708, %v593_v23   ;;  %857 = vperm.xlu1 %2709, %v596_v34   ;;  %v925_v44 = vadd.f32 1e-05, %v827_v32 }
 0x1c9   : > { %v814_v45 = vmul.f32 %v595_v37, %v595_v37  ;;  %v800_v46 = vmul.f32 0.03125, %v739_v42  ;;  %v2502_v47 = vpop.f32.mrb[10].mxu1  ;;  %v924_v56 = vadd.f32 1e-05, %v826_v36 }
 0x1ca   : > { %v829_v48 = vsub.f32 %v801_v40, %v815_v39  ;;  %v598_v49 = vmul.f32 0.03125, %v2502_v47  ;;  %v544_v50 = vpop.f32.mrb[11].mxu1  ;;  %2710 = vrsqrt.f32 %v925_v44 }
 0x1cb   : > { %v828_v51 = vsub.f32 %v800_v46, %v814_v45  ;;  %v597_v53 = vmul.f32 0.03125, %v544_v50  ;;  %v2531_v55 = vpop.f32.mrb[12].mxu0  ;;  %2712 = vrsqrt.f32 %v924_v56 }
 0x1cc   : > { %v2959_v57 = vmul.f32 %v598_v49, %v598_v49  ;;  %v2961_v58 = vmul.f32 0.03125, %v2531_v55  ;;  %v749_v59 = vpop.f32.mrb[13].mxu0  ;;  %852 = vperm.xlu0 %2708, %v595_v37   ;;  %867 = vperm.xlu1 %2709, %v598_v49   ;;  %v927_v35 = vadd.f32 1e-05, %v829_v48 }
 0x1cd   : > { %v816_v0 = vmul.f32 %v597_v53, %v597_v53  ;;  %v802_v2 = vmul.f32 0.03125, %v749_v59  ;;  %v2505_v4 = vpop.f32.mrb[12].mxu1  ;;  %v926_v20 = vadd.f32 1e-05, %v828_v51 }
 0x1ce   : > { %v831_v7 = vsub.f32 %v2961_v58, %v2959_v57  ;;  %v600_v8 = vmul.f32 0.03125, %v2505_v4  ;;  %v554_v11 = vpop.f32.mrb[13].mxu1 }
 0x1cf   : > { %v830_v12 = vsub.f32 %v802_v2, %v816_v0  ;;  %v599_v14 = vmul.f32 0.03125, %v554_v11  ;;  %v2534_v15 = vpop.f32.mrb[14].mxu0  ;;  %2714 = vrsqrt.f32 %v926_v20 }
 0x1d0   : > { %v2971_v17 = vmul.f32 %v600_v8, %v600_v8  ;;  %v2973_v18 = vmul.f32 0.03125, %v2534_v15  ;;  %v759_v19 = vpop.f32.mrb[15].mxu0  ;;  %862 = vperm.xlu0 %2708, %v597_v53   ;;  %877 = vperm.xlu1 %2709, %v600_v8   ;;  %2716 = vrsqrt.f32 %v927_v35  ;;  %v929_v4 = vadd.f32 1e-05, %v831_v7 }
 0x1d1   : > { %v818_v21 = vmul.f32 %v599_v14, %v599_v14  ;;  %v804_v22 = vmul.f32 0.03125, %v759_v19  ;;  %v2508_v23 = vpop.f32.mrb[14].mxu1  ;;  %v928_v49 = vadd.f32 1e-05, %v830_v12  ;;  %v206_v12 = vld [vmem:[%s3360_s1 + $0x20] sm:$0xff] }
 0x1d2   : > { %v833_v24 = vsub.f32 %v2973_v18, %v2971_v17  ;;  %v602_v25 = vmul.f32 0.03125, %v2508_v23  ;;  %v564_v26 = vpop.f32.mrb[15].mxu1 }
 0x1d3   : > { %v832_v27 = vsub.f32 %v804_v22, %v818_v21  ;;  %v601_v28 = vmul.f32 0.03125, %v564_v26  ;;  %v2537_v29 = vpop.f32.mrb[16].mxu0  ;;  %2718 = vrsqrt.f32 %v928_v49 }
 0x1d4   : > { %v821_v30 = vmul.f32 %v602_v25, %v602_v25  ;;  %v807_v32 = vmul.f32 0.03125, %v2537_v29  ;;  %v769_v34 = vpop.f32.mrb[17].mxu0  ;;  %872 = vperm.xlu0 %2708, %v599_v14   ;;  %887 = vperm.xlu1 %2709, %v602_v25   ;;  %v2711_v44 = vpop.eup %2710  ;;  %v207_v14 = vld [vmem:[%s3360_s1 + $0x28] sm:$0xff]  ;;  %2720 = vrsqrt.f32 %v929_v4  ;;  %v931_v22 = vadd.f32 1e-05, %v833_v24 }
 0x1d5   : > { %v820_v36 = vmul.f32 %v601_v28, %v601_v28  ;;  %v806_v37 = vmul.f32 0.03125, %v769_v34  ;;  %v2511_v38 = vpop.f32.mrb[16].mxu1  ;;  %v2713_v61 = vpop.eup %2712  ;;  %v930_v15 = vadd.f32 1e-05, %v832_v27  ;;  %v2676_v19 = vpack.c.bf16 %v207_v14, %v206_v12 }
 0x1d6   : > { %v835_v39 = vsub.f32 %v807_v32, %v821_v30  ;;  %v604_v40 = vmul.f32 0.03125, %v2511_v38  ;;  %v574_v42 = vpop.f32.mrb[17].mxu1 }
 0x1d7   : > { %v834_v45 = vsub.f32 %v806_v37, %v820_v36  ;;  %v603_v46 = vmul.f32 0.03125, %v574_v42  ;;  %v2540_v47 = vpop.f32.mrb[18].mxu0  ;;  %2677 = vmatprep.subr.bf16.mxu1 %v2676_v19  ;;  %2722 = vrsqrt.f32 %v930_v15 }
 0x1d8   : > { %959 = vperm.xlu1 %2709, %v2711_v44   ;;  %882 = vperm.xlu0 %2708, %v601_v28   ;;  %v823_v50 = vmul.f32 %v604_v40, %v604_v40  ;;  %v809_v51 = vmul.f32 0.03125, %v2540_v47  ;;  %v779_v53 = vpop.f32.mrb[19].mxu0  ;;  %2724 = vrsqrt.f32 %v931_v22  ;;  %v933_v26 = vadd.f32 1e-05, %v835_v39 }
 0x1d9   : > { %v822_v55 = vmul.f32 %v603_v46, %v603_v46  ;;  %v808_v48 = vmul.f32 0.03125, %v779_v53  ;;  %v2514_v56 = vpop.f32.mrb[18].mxu1  ;;  %v2715_v7 = vpop.eup %2714  ;;  %v932_v23 = vadd.f32 1e-05, %v834_v45  ;;  %2679 = vmatpush3.bf16.msra.mxu1 %v2676_v19 }
 0x1da   : > { %v837_v57 = vsub.f32 %v809_v51, %v823_v50  ;;  %v606_v58 = vmul.f32 0.03125, %v2514_v56  ;;  %v584_v59 = vpop.f32.mrb[19].mxu1  ;;  %2684 = vmatprep.subr.bf16.mxu1 %v2774_v3  ;;  %v2717_v25 = vpop.eup %2716 }
 0x1db   : > { %v836_v62 = vsub.f32 %v808_v48, %v822_v55  ;;  %v605_v0 = vmul.f32 0.03125, %v584_v59  ;;  %v2543_v2 = vpop.f32.mrb[20].mxu0  ;;  %2726 = vrsqrt.f32 %v932_v23 }
 0x1dc   : > { %954 = vperm.xlu1 %2709, %v2713_v61   ;;  %892 = vperm.xlu0 %2708, %v603_v46   ;;  %v825_v5 = vmul.f32 %v606_v58, %v606_v58  ;;  %v811_v8 = vmul.f32 0.03125, %v2543_v2  ;;  %v789_v11 = vpop.f32.mrb[21].mxu0  ;;  %2728 = vrsqrt.f32 %v933_v26  ;;  %v935_v29 = vadd.f32 1e-05, %v837_v57  ;;  %v2991_v61 = vld [vmem:[%s3361_s2 + $0x1] ss:$0 sm:$0xff] }
 0x1dd   : > { %v824_v17 = vmul.f32 %v605_v0, %v605_v0  ;;  %v810_v18 = vmul.f32 0.03125, %v789_v11  ;;  %v934_v27 = vadd.f32 1e-05, %v836_v62  ;;  %v2719_v28 = vpop.eup %2718 }
 0x1de   : > { %v839_v20 = vsub.f32 %v811_v8, %v825_v5  ;;  %v2721_v30 = vpop.eup %2720 }
 0x1df   : > { %v838_v21 = vsub.f32 %v810_v18, %v824_v17  ;;  %2730 = vrsqrt.f32 %v934_v27 }
 0x1e0   : > { %897 = vperm.xlu1 %2709, %v604_v40   ;;  %964 = vperm.xlu0 %2708, %v2715_v7   ;;  %2732 = vrsqrt.f32 %v935_v29  ;;  %v937_v34 = vadd.f32 1e-05, %v839_v20 }
 0x1e1   : > { %v936_v24 = vadd.f32 1e-05, %v838_v21  ;;  %v2723_v32 = vpop.eup %2722 }
 0x1e2   : > { %v2725_v35 = vpop.eup %2724 }
 0x1e3   : > { %2734 = vrsqrt.f32 %v936_v24 }
 0x1e4   : > { %969 = vperm.xlu1 %2709, %v2717_v25   ;;  %902 = vperm.xlu0 %2708, %v605_v0   ;;  %2736 = vrsqrt.f32 %v937_v34 }
 0x1e5   : > { %v2727_v36 = vpop.eup %2726 }
 0x1e6   : > { %v2729_v37 = vpop.eup %2728 }
 0x1e8   : > { %907 = vperm.xlu1 %2709, %v606_v58   ;;  %974 = vperm.xlu0 %2708, %v2719_v28  }
 0x1e9   : > { %v2731_v38 = vpop.eup %2730 }
 0x1ea   : > { %v2733_v39 = vpop.eup %2732 }
 0x1ec   : > { %979 = vperm.xlu1 %2709, %v2721_v30   ;;  %984 = vperm.xlu0 %2708, %v2723_v32  }
 0x1ed   : > { %v2735_v40 = vpop.eup %2734 }
 0x1ee   : > { %v2737_v42 = vpop.eup %2736 }
 0x1f0   : > { %989 = vperm.xlu1 %2709, %v2725_v35   ;;  %994 = vperm.xlu0 %2708, %v2727_v36  }
 0x1f4   : > { %999 = vperm.xlu1 %2709, %v2729_v37   ;;  %1004 = vperm.xlu0 %2708, %v2731_v38  }
 0x1f8   : > { %1009 = vperm.xlu1 %2709, %v2733_v39   ;;  %1014 = vperm.xlu0 %2708, %v2735_v40  }
 0x1fc   : > { %1019 = vperm.xlu1 %2709, %v2737_v42  }
 0x243   : > { %v848_v44 = vpop.permute.xlu0 %847 }
 0x244   : > { %v911_v48 = vsub.f32 %v2846_v31, %v848_v44  ;;  %v2998_v31 = vld [vmem:[%s3361_s2 + $0x2] ss:$0 sm:$0xff] }
 0x247   : > { %v843_v45 = vpop.permute.xlu0 %842  ;;  %v858_v46 = vpop.permute.xlu1 %857 }
 0x248   : > { %v910_v59 = vsub.f32 %v2848_v33, %v843_v45  ;;  %v913_v17 = vsub.f32 %v2858_v41, %v858_v46 }
 0x24b   : > { %v853_v47 = vpop.permute.xlu0 %852  ;;  %v868_v49 = vpop.permute.xlu1 %867 }
 0x24c   : > { %v912_v5 = vsub.f32 %v2862_v43, %v853_v47  ;;  %v915_v27 = vsub.f32 %v2876_v52, %v868_v49 }
 0x24f   : > { %v863_v50 = vpop.permute.xlu0 %862  ;;  %v878_v51 = vpop.permute.xlu1 %877 }
 0x250   : > { %v914_v41 = vsub.f32 %v2881_v54, %v863_v50  ;;  %v917_v35 = vsub.f32 %v2897_v63, %v878_v51 }
 0x253   : > { %v873_v53 = vpop.permute.xlu0 %872  ;;  %v2984_v55 = vpop.permute.xlu1 %887 }
 0x254   : > { %v916_v28 = vsub.f32 %v2902_v1, %v873_v53 }
 0x257   : > { %v960_v56 = vpop.permute.xlu1 %959  ;;  %v883_v57 = vpop.permute.xlu0 %882 }
 0x258   : > { %v1023_v58 = vmul.f32 %v960_v56, %v911_v48 }
 0x25a   : > { %v1041_v4 = vmul.f32 %v2991_v61, %v1023_v58 }
 0x25b   : > { %v955_v62 = vpop.permute.xlu1 %954  ;;  %v893_v0 = vpop.permute.xlu0 %892 }
 0x25c   : > { %v1022_v2 = vmul.f32 %v955_v62, %v910_v59  ;;  %v3007_v15 = vadd.f32 %v2998_v31, %v1041_v4  ;;  %v920_v63 = vsub.f32 %v2913_v6, %v893_v0 }
 0x25e   : > { %v1040_v8 = vmul.f32 %v2991_v61, %v1022_v2 }
 0x25f   : > { %v3001_v33 = vpop.permute.xlu1 %897  ;;  %v965_v11 = vpop.permute.xlu0 %964 }
 0x260   : > { %v3004_v12 = vadd.f32 %v2998_v31, %v1040_v8  ;;  %v1024_v14 = vmul.f32 %v965_v11, %v912_v5  ;;  %v921_v51 = vsub.f32 %v2926_v10, %v3001_v33 }
 0x262   : > { %v1042_v43 = vmul.f32 %v2991_v61, %v1024_v14  ;;  %2552 = vmatprep.mubr.msk.f32.mxu1 %vm415_vm1, %v3004_v12  ;;  %v3104_v14 = vld [vmem:[%s3361_s2 + $0x3] ss:$0 sm:$0xff] }
 0x263   : > { %2553 = vmatmul.mubr.msk.f32.vlgmr.msra.gmra.mrb[20].mxu1 %vm415_vm1, %v3007_v15  ;;  %v970_v18 = vpop.permute.xlu1 %969  ;;  %v903_v19 = vpop.permute.xlu0 %902 }
 0x264   : > { %v3016_v20 = vadd.f32 %v2998_v31, %v1042_v43  ;;  %v1025_v7 = vmul.f32 %v970_v18, %v913_v17  ;;  %2685 = vmatpush3.bf16.msra.mxu1 %v2774_v3  ;;  %v922_v53 = vsub.f32 %v2932_v13, %v903_v19 }
 0x265   : > { %2686 = vmatprep.subr.bf16.mxu1 %v2774_v3 }
 0x266   : > { %v1043_v21 = vmul.f32 %v2991_v61, %v1025_v7  ;;  %2555 = vmatprep.mubr.msk.f32.mxu1 %vm415_vm1, %v3016_v20 }
 0x267   : > { %v908_v22 = vpop.permute.xlu1 %907  ;;  %v975_v23 = vpop.permute.xlu0 %974 }
 0x268   : > { %v3025_v25 = vadd.f32 %v2998_v31, %v1043_v21  ;;  %v1026_v26 = vmul.f32 %v975_v23, %v914_v41  ;;  %2687 = vmatpush3.bf16.msra.mxu1 %v2774_v3  ;;  %v918_v3 = vsub.f32 %v2891_v60, %v883_v57  ;;  %v919_v60 = vsub.f32 %v2918_v9, %v2984_v55 }
 0x269   : > { %v923_v62 = vsub.f32 %v2943_v16, %v908_v22 }
 0x26a   : > { %v1044_v29 = vmul.f32 %v2991_v61, %v1026_v26  ;;  %2556 = vmatmul.mubr.msk.f32.gmra.mrb[22].mxu1 %vm415_vm1, %v3025_v25 }
 0x26b   : > { %v980_v54 = vpop.permute.xlu1 %979  ;;  %v985_v24 = vpop.permute.xlu0 %984 }
 0x26c   : > { %v3034_v30 = vadd.f32 %v2998_v31, %v1044_v29  ;;  %v1027_v32 = vmul.f32 %v980_v54, %v915_v27  ;;  %v1028_v34 = vmul.f32 %v985_v24, %v916_v28 }
 0x26e   : > { %v1045_v52 = vmul.f32 %v2991_v61, %v1027_v32  ;;  %v1046_v1 = vmul.f32 %v2991_v61, %v1028_v34  ;;  %2558 = vmatprep.mubr.msk.f32.mxu1 %vm415_vm1, %v3034_v30 }
 0x26f   : > { %v990_v36 = vpop.permute.xlu1 %989  ;;  %v995_v37 = vpop.permute.xlu0 %994 }
 0x270   : > { %v3043_v38 = vadd.f32 %v2998_v31, %v1045_v52  ;;  %v3046_v39 = vadd.f32 %v2998_v31, %v1046_v1  ;;  %v1029_v40 = vmul.f32 %v990_v36, %v917_v35  ;;  %v1030_v42 = vmul.f32 %v995_v37, %v918_v3 }
 0x272   : > { %v1047_v44 = vmul.f32 %v2991_v61, %v1029_v40  ;;  %v1048_v45 = vmul.f32 %v2991_v61, %v1030_v42  ;;  %2559 = vmatmul.mubr.msk.f32.gmra.mrb[24].mxu1 %vm415_vm1, %v3043_v38 }
 0x273   : > { %v1000_v46 = vpop.permute.xlu1 %999  ;;  %2561 = vmatprep.mubr.msk.f32.mxu1 %vm415_vm1, %v3046_v39  ;;  %v1005_v47 = vpop.permute.xlu0 %1004 }
 0x274   : > { %v3058_v49 = vadd.f32 %v2998_v31, %v1047_v44  ;;  %v3061_v50 = vadd.f32 %v2998_v31, %v1048_v45  ;;  %v1031_v9 = vmul.f32 %v1000_v46, %v919_v60  ;;  %v1032_v6 = vmul.f32 %v1005_v47, %v920_v63 }
 0x276   : > { %v1049_v55 = vmul.f32 %v2991_v61, %v1031_v9  ;;  %v1050_v48 = vmul.f32 %v2991_v61, %v1032_v6  ;;  %2562 = vmatmul.mubr.msk.f32.gmra.mrb[26].mxu1 %vm415_vm1, %v3058_v49 }
 0x277   : > { %v1010_v56 = vpop.permute.xlu1 %1009  ;;  %2564 = vmatprep.mubr.msk.f32.mxu1 %vm415_vm1, %v3061_v50  ;;  %v1015_v57 = vpop.permute.xlu0 %1014 }
 0x278   : > { %v3073_v58 = vadd.f32 %v2998_v31, %v1049_v55  ;;  %v3076_v59 = vadd.f32 %v2998_v31, %v1050_v48  ;;  %v1033_v10 = vmul.f32 %v1010_v56, %v921_v51  ;;  %v1034_v13 = vmul.f32 %v1015_v57, %v922_v53 }
 0x27a   : > { %v1051_v0 = vmul.f32 %v2991_v61, %v1033_v10  ;;  %v1052_v2 = vmul.f32 %v2991_v61, %v1034_v13  ;;  %2565 = vmatmul.mubr.msk.f32.gmra.mrb[28].mxu1 %vm415_vm1, %v3073_v58 }
 0x27b   : > { %v1020_v4 = vpop.permute.xlu1 %1019  ;;  %2567 = vmatprep.mubr.msk.f32.mxu1 %vm415_vm1, %v3076_v59 }
 0x27c   : > { %v3086_v5 = vadd.f32 %v2998_v31, %v1051_v0  ;;  %v3089_v8 = vadd.f32 %v2998_v31, %v1052_v2  ;;  %v1035_v33 = vmul.f32 %v1020_v4, %v923_v62 }
 0x27e   : > { %v1053_v16 = vmul.f32 %v2991_v61, %v1035_v33  ;;  %2568 = vmatmul.mubr.msk.f32.gmra.mrb[30].mxu1 %vm415_vm1, %v3086_v5 }
 0x27f   : > { %2570 = vmatprep.mubr.msk.f32.mxu1 %vm415_vm1, %v3089_v8 }
 0x280   : > { %v3097_v11 = vadd.f32 %v2998_v31, %v1053_v16 }
 0x282   : > { %2571 = vmatmul.mubr.msk.f32.gmra.mrb[32].mxu1 %vm415_vm1, %v3097_v11 }
 0x336   : > { %v2554_v17 = vpop.f32.mrb[20].mxu1 }
 0x337   : > { %v1190_v61 = vadd.f32 %v2554_v17, %v3104_v14  ;;  %v1184_v43 = vpop.f32.mrb[21].mxu1 }
 0x338   : > { %v1185_v18 = vadd.f32 %v3104_v14, %v1184_v43 }
 0x339   : > { %v3108_v19 = vmax.f32 %v1190_v61, 0.0 }
 0x33a   : > { %v3110_v7 = vmax.f32 %v1185_v18, 0.0 }
 0x33b   : > { %v1459_v41 = vmul.f32 %v3108_v19, %v3108_v19 }
 0x33c   : > { %v1458_v31 = vmul.f32 %v3110_v7, %v3110_v7  ;;  %2581 = vmatprep.mubr.msk.f32.mxu0 %vm415_vm1, %v3110_v7 }
 0x33d   : > { %v2557_v21 = vpop.f32.mrb[22].mxu1  ;;  %2582 = vmatmul.mubr.msk.f32.vlgmr.msra.gmra.mrb[22].mxu0 %vm415_vm1, %v3108_v19 }
 0x33e   : > { %v1200_v22 = vadd.f32 %v2557_v21, %v3104_v14  ;;  %v1194_v23 = vpop.f32.mrb[23].mxu1  ;;  %2610 = vmatprep.mubr.msk.f32.mxu1 %vm415_vm1, %v1458_v31 }
 0x33f   : > { %v1195_v26 = vadd.f32 %v3104_v14, %v1194_v23  ;;  %2611 = vmatmul.mubr.msk.f32.vlgmr.msra.gmra.mrb[34].mxu1 %vm415_vm1, %v1459_v41 }
 0x340   : > { %v3124_v27 = vmax.f32 %v1200_v22, 0.0 }
 0x341   : > { %v3126_v28 = vmax.f32 %v1195_v26, 0.0 }
 0x342   : > { %v1461_v54 = vmul.f32 %v3124_v27, %v3124_v27 }
 0x343   : > { %v1460_v29 = vmul.f32 %v3126_v28, %v3126_v28  ;;  %2584 = vmatprep.mubr.msk.f32.mxu0 %vm415_vm1, %v3126_v28 }
 0x344   : > { %2585 = vmatmul.mubr.msk.f32.gmra.mrb[24].mxu0 %vm415_vm1, %v3124_v27 }
 0x345   : > { %v2560_v24 = vpop.f32.mrb[24].mxu1  ;;  %2613 = vmatprep.mubr.msk.f32.mxu1 %vm415_vm1, %v1460_v29 }
 0x346   : > { %v1210_v32 = vadd.f32 %v2560_v24, %v3104_v14  ;;  %v1204_v34 = vpop.f32.mrb[25].mxu1  ;;  %2614 = vmatmul.mubr.msk.f32.gmra.mrb[36].mxu1 %vm415_vm1, %v1461_v54 }
 0x347   : > { %v1205_v35 = vadd.f32 %v3104_v14, %v1204_v34 }
 0x348   : > { %v3140_v3 = vmax.f32 %v1210_v32, 0.0 }
 0x349   : > { %v3142_v52 = vmax.f32 %v1205_v35, 0.0  ;;  %v2563_v1 = vpop.f32.mrb[26].mxu1 }
 0x34a   : > { %v1220_v36 = vadd.f32 %v2563_v1, %v3104_v14  ;;  %v1214_v37 = vpop.f32.mrb[27].mxu1  ;;  %v1463_v60 = vmul.f32 %v3140_v3, %v3140_v3 }
 0x34b   : > { %v1462_v40 = vmul.f32 %v3142_v52, %v3142_v52  ;;  %v1215_v42 = vadd.f32 %v3104_v14, %v1214_v37  ;;  %2587 = vmatprep.mubr.msk.f32.mxu0 %vm415_vm1, %v3142_v52 }
 0x34c   : > { %v3152_v63 = vmax.f32 %v1220_v36, 0.0  ;;  %2588 = vmatmul.mubr.msk.f32.gmra.mrb[26].mxu0 %vm415_vm1, %v3140_v3 }
 0x34d   : > { %v3156_v44 = vmax.f32 %v1215_v42, 0.0  ;;  %v2566_v45 = vpop.f32.mrb[28].mxu1  ;;  %2616 = vmatprep.mubr.msk.f32.mxu1 %vm415_vm1, %v1462_v40 }
 0x34e   : > { %v1230_v46 = vadd.f32 %v2566_v45, %v3104_v14  ;;  %v1224_v47 = vpop.f32.mrb[29].mxu1  ;;  %2617 = vmatmul.mubr.msk.f32.gmra.mrb[38].mxu1 %vm415_vm1, %v1463_v60  ;;  %v1465_v51 = vmul.f32 %v3152_v63, %v3152_v63 }
 0x34f   : > { %v1464_v9 = vmul.f32 %v3156_v44, %v3156_v44  ;;  %v1225_v6 = vadd.f32 %v3104_v14, %v1224_v47  ;;  %2590 = vmatprep.mubr.msk.f32.mxu0 %vm415_vm1, %v3156_v44 }
 0x350   : > { %v3168_v53 = vmax.f32 %v1230_v46, 0.0  ;;  %2591 = vmatmul.mubr.msk.f32.gmra.mrb[28].mxu0 %vm415_vm1, %v3152_v63 }
 0x351   : > { %v3172_v55 = vmax.f32 %v1225_v6, 0.0  ;;  %v2569_v48 = vpop.f32.mrb[30].mxu1  ;;  %2619 = vmatprep.mubr.msk.f32.mxu1 %vm415_vm1, %v1464_v9 }
 0x352   : > { %v1240_v56 = vadd.f32 %v2569_v48, %v3104_v14  ;;  %v1234_v57 = vpop.f32.mrb[31].mxu1  ;;  %2620 = vmatmul.mubr.msk.f32.gmra.mrb[40].mxu1 %vm415_vm1, %v1465_v51  ;;  %v1467_v62 = vmul.f32 %v3168_v53, %v3168_v53 }
 0x353   : > { %v1466_v10 = vmul.f32 %v3172_v55, %v3172_v55  ;;  %v1235_v13 = vadd.f32 %v3104_v14, %v1234_v57  ;;  %2593 = vmatprep.mubr.msk.f32.mxu0 %vm415_vm1, %v3172_v55 }
 0x354   : > { %v3184_v0 = vmax.f32 %v1240_v56, 0.0  ;;  %2594 = vmatmul.mubr.msk.f32.gmra.mrb[30].mxu0 %vm415_vm1, %v3168_v53 }
 0x355   : > { %v3188_v2 = vmax.f32 %v1235_v13, 0.0  ;;  %v2572_v4 = vpop.f32.mrb[32].mxu1  ;;  %2622 = vmatprep.mubr.msk.f32.mxu1 %vm415_vm1, %v1466_v10 }
 0x356   : > { %v1250_v33 = vadd.f32 %v2572_v4, %v3104_v14  ;;  %v1244_v16 = vpop.f32.mrb[33].mxu1  ;;  %2623 = vmatmul.mubr.msk.f32.gmra.mrb[42].mxu1 %vm415_vm1, %v1467_v62  ;;  %v1469_v43 = vmul.f32 %v3184_v0, %v3184_v0 }
 0x357   : > { %v1468_v17 = vmul.f32 %v3188_v2, %v3188_v2  ;;  %v1245_v61 = vadd.f32 %v3104_v14, %v1244_v16  ;;  %2596 = vmatprep.mubr.msk.f32.mxu0 %vm415_vm1, %v3188_v2 }
 0x358   : > { %v3200_v18 = vmax.f32 %v1250_v33, 0.0  ;;  %2597 = vmatmul.mubr.msk.f32.gmra.mrb[32].mxu0 %vm415_vm1, %v3184_v0 }
 0x359   : > { %v3204_v31 = vmax.f32 %v1245_v61, 0.0  ;;  %2625 = vmatprep.mubr.msk.f32.mxu1 %vm415_vm1, %v1468_v17 }
 0x35a   : > { %2626 = vmatmul.mubr.msk.f32.gmra.mrb[44].mxu1 %vm415_vm1, %v1469_v43  ;;  %v1471_v41 = vmul.f32 %v3200_v18, %v3200_v18 }
 0x35b   : > { %v1470_v14 = vmul.f32 %v3204_v31, %v3204_v31  ;;  %2599 = vmatprep.mubr.msk.f32.mxu0 %vm415_vm1, %v3204_v31 }
 0x35c   : > { %2600 = vmatmul.mubr.msk.f32.gmra.mrb[34].mxu0 %vm415_vm1, %v3200_v18 }
 0x35d   : > { %2628 = vmatprep.mubr.msk.f32.mxu1 %vm415_vm1, %v1470_v14 }
 0x35e   : > { %2629 = vmatmul.mubr.msk.f32.gmra.mrb[46].mxu1 %vm415_vm1, %v1471_v41 }
 0x410   : > { %v2583_v21 = vpop.f32.mrb[22].mxu0 }
 0x411   : > { %v1445_v22 = vmul.f32 0.03125, %v2583_v21  ;;  %v1375_v23 = vpop.f32.mrb[23].mxu0 }
 0x412   : > { %v1444_v26 = vmul.f32 0.03125, %v1375_v23  ;;  %v2612_v29 = vpop.f32.mrb[34].mxu1  ;;  %v209_v23 = vld [vmem:[%s3360_s1 + $0x38] sm:$0xff] }
 0x413   : > { %v1664_v54 = vmul.f32 %v1445_v22, %v1445_v22  ;;  %v1650_v24 = vmul.f32 0.03125, %v2612_v29  ;;  %1698 = vperm.xlu1 %2709, %v1445_v22   ;;  %v1580_v32 = vpop.f32.mrb[35].mxu1  ;;  %v208_v22 = vld [vmem:[%s3360_s1 + $0x30] sm:$0xff] }
 0x414   : > { %v1663_v34 = vmul.f32 %v1444_v26, %v1444_v26  ;;  %v1649_v35 = vmul.f32 0.03125, %v1580_v32  ;;  %1693 = vperm.xlu0 %2708, %v1444_v26  }
 0x415   : > { %v1678_v1 = vsub.f32 %v1650_v24, %v1664_v54  ;;  %v2688_v24 = vpack.c.bf16 %v209_v23, %v208_v22 }
 0x416   : > { %v1677_v36 = vsub.f32 %v1649_v35, %v1663_v34 }
 0x417   : > { %v2586_v37 = vpop.f32.mrb[24].mxu0  ;;  %v1776_v57 = vadd.f32 1e-05, %v1678_v1  ;;  %2689 = vmatprep.subr.bf16.mxu0 %v2688_v24 }
 0x418   : > { %v1447_v40 = vmul.f32 0.03125, %v2586_v37  ;;  %v1385_v42 = vpop.f32.mrb[25].mxu0  ;;  %v1775_v13 = vadd.f32 1e-05, %v1677_v36  ;;  %2691 = vmatpush3.bf16.msra.mxu0 %v2688_v24 }
 0x419   : > { %v1446_v60 = vmul.f32 0.03125, %v1385_v42  ;;  %v2615_v45 = vpop.f32.mrb[36].mxu1  ;;  %2738 = vrsqrt.f32 %v1776_v57 }
 0x41a   : > { %v1666_v46 = vmul.f32 %v1447_v40, %v1447_v40  ;;  %v1652_v47 = vmul.f32 0.03125, %v2615_v45  ;;  %1708 = vperm.xlu1 %2709, %v1447_v40   ;;  %v1590_v9 = vpop.f32.mrb[37].mxu1  ;;  %2740 = vrsqrt.f32 %v1775_v13 }
 0x41b   : > { %v1665_v6 = vmul.f32 %v1446_v60, %v1446_v60  ;;  %v1651_v51 = vmul.f32 0.03125, %v1590_v9  ;;  %1703 = vperm.xlu0 %2708, %v1446_v60  }
 0x41c   : > { %v1680_v48 = vsub.f32 %v1652_v47, %v1666_v46 }
 0x41d   : > { %v1679_v56 = vsub.f32 %v1651_v51, %v1665_v6 }
 0x41e   : > { %v1778_v40 = vadd.f32 1e-05, %v1680_v48 }
 0x41f   : > { %v2589_v10 = vpop.f32.mrb[26].mxu0  ;;  %v1777_v46 = vadd.f32 1e-05, %v1679_v56 }
 0x420   : > { %v1449_v62 = vmul.f32 0.03125, %v2589_v10  ;;  %v1395_v4 = vpop.f32.mrb[27].mxu0  ;;  %2742 = vrsqrt.f32 %v1778_v40 }
 0x421   : > { %v1448_v33 = vmul.f32 0.03125, %v1395_v4  ;;  %v2618_v16 = vpop.f32.mrb[38].mxu1  ;;  %2744 = vrsqrt.f32 %v1777_v46 }
 0x422   : > { %v1668_v17 = vmul.f32 %v1449_v62, %v1449_v62  ;;  %v1654_v61 = vmul.f32 0.03125, %v2618_v16  ;;  %1718 = vperm.xlu1 %2709, %v1449_v62   ;;  %v1600_v43 = vpop.f32.mrb[39].mxu1 }
 0x423   : > { %v1667_v14 = vmul.f32 %v1448_v33, %v1448_v33  ;;  %v1653_v41 = vmul.f32 0.03125, %v1600_v43  ;;  %v2592_v21 = vpop.f32.mrb[28].mxu0  ;;  %1713 = vperm.xlu0 %2708, %v1448_v33   ;;  %v2739_v56 = vpop.eup %2738 }
 0x424   : > { %v1682_v26 = vsub.f32 %v1654_v61, %v1668_v17  ;;  %v1451_v29 = vmul.f32 0.03125, %v2592_v21  ;;  %v1405_v54 = vpop.f32.mrb[29].mxu0  ;;  %v2741_v22 = vpop.eup %2740 }
 0x425   : > { %v1681_v32 = vsub.f32 %v1653_v41, %v1667_v14  ;;  %v1450_v34 = vmul.f32 0.03125, %v1405_v54  ;;  %v2621_v35 = vpop.f32.mrb[40].mxu1 }
 0x426   : > { %v1670_v1 = vmul.f32 %v1451_v29, %v1451_v29  ;;  %v1656_v36 = vmul.f32 0.03125, %v2621_v35  ;;  %1728 = vperm.xlu1 %2709, %v1451_v29   ;;  %v1610_v37 = vpop.f32.mrb[41].mxu1  ;;  %v1780_v24 = vadd.f32 1e-05, %v1682_v26 }
 0x427   : > { %v1669_v42 = vmul.f32 %v1450_v34, %v1450_v34  ;;  %v1655_v60 = vmul.f32 0.03125, %v1610_v37  ;;  %v2595_v45 = vpop.f32.mrb[30].mxu0  ;;  %1723 = vperm.xlu0 %2708, %v1450_v34  }
 0x428   : > { %v1684_v47 = vsub.f32 %v1656_v36, %v1670_v1  ;;  %v1453_v9 = vmul.f32 0.03125, %v2595_v45  ;;  %v1415_v6 = vpop.f32.mrb[31].mxu0  ;;  %v1779_v36 = vadd.f32 1e-05, %v1681_v32  ;;  %2746 = vrsqrt.f32 %v1780_v24 }
 0x429   : > { %v1683_v51 = vsub.f32 %v1655_v60, %v1669_v42  ;;  %v1452_v57 = vmul.f32 0.03125, %v1415_v6  ;;  %v2624_v10 = vpop.f32.mrb[42].mxu1  ;;  %v211_v6 = vld [vmem:[%s3360_s1 + $0x48] sm:$0xff] }
 0x42a   : > { %v1672_v13 = vmul.f32 %v1453_v9, %v1453_v9  ;;  %v1658_v62 = vmul.f32 0.03125, %v2624_v10  ;;  %1738 = vperm.xlu1 %2709, %v1453_v9   ;;  %v1620_v4 = vpop.f32.mrb[43].mxu1  ;;  %v210_v9 = vld [vmem:[%s3360_s1 + $0x40] sm:$0xff]  ;;  %v1782_v32 = vadd.f32 1e-05, %v1684_v47  ;;  %2748 = vrsqrt.f32 %v1779_v36 }
 0x42b   : > { %v1671_v33 = vmul.f32 %v1452_v57, %v1452_v57  ;;  %v1657_v16 = vmul.f32 0.03125, %v1620_v4  ;;  %v2598_v48 = vpop.f32.mrb[32].mxu0  ;;  %1733 = vperm.xlu0 %2708, %v1452_v57  }
 0x42c   : > { %v1686_v17 = vsub.f32 %v1658_v62, %v1672_v13  ;;  %v1455_v61 = vmul.f32 0.03125, %v2598_v48  ;;  %v1425_v43 = vpop.f32.mrb[33].mxu0  ;;  %v2692_v13 = vpack.c.bf16 %v211_v6, %v210_v9  ;;  %v2743_v48 = vpop.eup %2742  ;;  %2750 = vrsqrt.f32 %v1782_v32  ;;  %v3237_v32 = vld [vmem:[%s3361_s2 + $0x4] ss:$0 sm:$0xff] }
 0x42d   : > { %v1685_v14 = vsub.f32 %v1657_v16, %v1671_v33  ;;  %v1454_v41 = vmul.f32 0.03125, %v1425_v43  ;;  %v2627_v21 = vpop.f32.mrb[44].mxu1  ;;  %v1781_v33 = vadd.f32 1e-05, %v1683_v51 }
 0x42e   : > { %v1674_v23 = vmul.f32 %v1455_v61, %v1455_v61  ;;  %v1660_v29 = vmul.f32 0.03125, %v2627_v21  ;;  %1810 = vperm.xlu1 %2709, %v2739_v56   ;;  %v1630_v54 = vpop.f32.mrb[45].mxu1  ;;  %2693 = vmatprep.subr.bf16.mxu0 %v2692_v13  ;;  %v2745_v56 = vpop.eup %2744  ;;  %v1784_v21 = vadd.f32 1e-05, %v1686_v17 }
 0x42f   : > { %v1673_v34 = vmul.f32 %v1454_v41, %v1454_v41  ;;  %v1659_v35 = vmul.f32 0.03125, %v1630_v54  ;;  %1805 = vperm.xlu0 %2708, %v2741_v22   ;;  %v2601_v1 = vpop.f32.mrb[34].mxu0  ;;  %2695 = vmatpush3.bf16.msra.mxu0 %v2692_v13  ;;  %2752 = vrsqrt.f32 %v1781_v33 }
 0x430   : > { %v1688_v37 = vsub.f32 %v1660_v29, %v1674_v23  ;;  %v1457_v40 = vmul.f32 0.03125, %v2601_v1  ;;  %v1435_v42 = vpop.f32.mrb[35].mxu0  ;;  %2754 = vrsqrt.f32 %v1784_v21 }
 0x431   : > { %v1687_v60 = vsub.f32 %v1659_v35, %v1673_v34  ;;  %v1456_v45 = vmul.f32 0.03125, %v1435_v42  ;;  %v2630_v46 = vpop.f32.mrb[46].mxu1 }
 0x432   : > { %v1676_v26 = vmul.f32 %v1457_v40, %v1457_v40  ;;  %v1662_v57 = vmul.f32 0.03125, %v2630_v46  ;;  %1748 = vperm.xlu1 %2709, %v1455_v61   ;;  %v1640_v10 = vpop.f32.mrb[47].mxu1  ;;  %v1783_v61 = vadd.f32 1e-05, %v1685_v14  ;;  %v1786_v47 = vadd.f32 1e-05, %v1688_v37  ;;  %v2747_v22 = vpop.eup %2746 }
 0x433   : > { %v1675_v62 = vmul.f32 %v1456_v45, %v1456_v45  ;;  %v1661_v4 = vmul.f32 0.03125, %v1640_v10  ;;  %1743 = vperm.xlu0 %2708, %v1454_v41   ;;  %v1785_v41 = vadd.f32 1e-05, %v1687_v60 }
 0x434   : > { %v1690_v16 = vsub.f32 %v1662_v57, %v1676_v26  ;;  %2756 = vrsqrt.f32 %v1783_v61  ;;  %v2749_v51 = vpop.eup %2748 }
 0x435   : > { %v1689_v43 = vsub.f32 %v1661_v4, %v1675_v62  ;;  %2758 = vrsqrt.f32 %v1786_v47 }
 0x436   : > { %1820 = vperm.xlu1 %2709, %v2743_v48   ;;  %v1788_v23 = vadd.f32 1e-05, %v1690_v16  ;;  %2760 = vrsqrt.f32 %v1785_v41  ;;  %v2751_v54 = vpop.eup %2750  ;;  %v3242_v16 = vld [vmem:[%s3361_s2 + $0x5] ss:$0 sm:$0xff] }
 0x437   : > { %1815 = vperm.xlu0 %2708, %v2745_v56   ;;  %v1787_v29 = vadd.f32 1e-05, %v1689_v43 }
 0x438   : > { %2762 = vrsqrt.f32 %v1788_v23 }
 0x439   : > { %v2753_v24 = vpop.eup %2752  ;;  %2764 = vrsqrt.f32 %v1787_v29 }
 0x43a   : > { %1758 = vperm.xlu1 %2709, %v1457_v40   ;;  %v2755_v17 = vpop.eup %2754 }
 0x43b   : > { %1753 = vperm.xlu0 %2708, %v1456_v45  }
 0x43e   : > { %1830 = vperm.xlu1 %2709, %v2747_v22   ;;  %v2757_v14 = vpop.eup %2756 }
 0x43f   : > { %1825 = vperm.xlu0 %2708, %v2749_v51   ;;  %v2759_v34 = vpop.eup %2758 }
 0x440   : > { %v2761_v35 = vpop.eup %2760 }
 0x442   : > { %1840 = vperm.xlu1 %2709, %v2751_v54   ;;  %v2763_v1 = vpop.eup %2762 }
 0x443   : > { %1835 = vperm.xlu0 %2708, %v2753_v24   ;;  %v2765_v36 = vpop.eup %2764 }
 0x446   : > { %1850 = vperm.xlu1 %2709, %v2755_v17  }
 0x447   : > { %1845 = vperm.xlu0 %2708, %v2757_v14  }
 0x44a   : > { %1860 = vperm.xlu1 %2709, %v2759_v34  }
 0x44b   : > { %1855 = vperm.xlu0 %2708, %v2761_v35  }
 0x44e   : > { %1870 = vperm.xlu1 %2709, %v2763_v1  }
 0x44f   : > { %1865 = vperm.xlu0 %2708, %v2765_v36  }
 0x492   : > { %v1699_v37 = vpop.permute.xlu1 %1698 }
 0x493   : > { %v1694_v40 = vpop.permute.xlu0 %1693  ;;  %v1762_v10 = vsub.f32 %v3108_v19, %v1699_v37 }
 0x494   : > { %v1761_v13 = vsub.f32 %v3110_v7, %v1694_v40 }
 0x499   : > { %v1709_v42 = vpop.permute.xlu1 %1708 }
 0x49a   : > { %v1704_v60 = vpop.permute.xlu0 %1703  ;;  %v1764_v47 = vsub.f32 %v3124_v27, %v1709_v42 }
 0x49b   : > { %v1763_v41 = vsub.f32 %v3126_v28, %v1704_v60 }
 0x4a1   : > { %v1719_v45 = vpop.permute.xlu1 %1718 }
 0x4a2   : > { %v1714_v46 = vpop.permute.xlu0 %1713  ;;  %v1766_v35 = vsub.f32 %v3140_v3, %v1719_v45 }
 0x4a5   : > { %v1729_v9 = vpop.permute.xlu1 %1728 }
 0x4a6   : > { %v1724_v6 = vpop.permute.xlu0 %1723 }
 0x4a7   : > { %v1767_v3 = vsub.f32 %v3156_v44, %v1724_v6 }
 0x4a9   : > { %v1739_v26 = vpop.permute.xlu1 %1738 }
 0x4aa   : > { %v3230_v57 = vpop.permute.xlu0 %1733 }
 0x4ad   : > { %v1811_v62 = vpop.permute.xlu1 %1810 }
 0x4ae   : > { %v1874_v4 = vmul.f32 %v1811_v62, %v1762_v10  ;;  %v1806_v33 = vpop.permute.xlu0 %1805  ;;  %v1768_v10 = vsub.f32 %v3152_v63, %v1729_v9  ;;  %v1769_v9 = vsub.f32 %v3172_v55, %v3230_v57 }
 0x4af   : > { %v1873_v48 = vmul.f32 %v1806_v33, %v1761_v13  ;;  %v1770_v33 = vsub.f32 %v3168_v53, %v1739_v26 }
 0x4b0   : > { %v1892_v43 = vmul.f32 %v3237_v32, %v1874_v4 }
 0x4b1   : > { %v1891_v19 = vmul.f32 %v3237_v32, %v1873_v48  ;;  %v3246_v56 = vpop.permute.xlu1 %1748 }
 0x4b2   : > { %v1910_v7 = vadd.f32 %v3242_v16, %v1892_v43  ;;  %v3249_v21 = vpop.permute.xlu0 %1743  ;;  %v1772_v53 = vsub.f32 %v3184_v0, %v3246_v56 }
 0x4b3   : > { %v1909_v61 = vadd.f32 %v3242_v16, %v1891_v19 }
 0x4b4   : > { %v1924_v23 = vadd.f32 %v1910_v7, %v3007_v15  ;;  %v1765_v15 = vsub.f32 %v3142_v52, %v1714_v46 }
 0x4b5   : > { %v1923_v22 = vadd.f32 %v1909_v61, %v3004_v12  ;;  %v1821_v51 = vpop.permute.xlu1 %1820 }
 0x4b6   : > { %v1876_v29 = vmul.f32 %v1821_v51, %v1764_v47  ;;  %v1816_v54 = vpop.permute.xlu0 %1815 }
 0x4b7   : > { %v1875_v24 = vmul.f32 %v1816_v54, %v1763_v41  ;;  %2639 = vmatprep.mubr.msk.f32.mxu0 %vm415_vm1, %v1923_v22 }
 0x4b8   : > { %v1894_v17 = vmul.f32 %v3237_v32, %v1876_v29  ;;  %2640 = vmatmul.mubr.msk.f32.vlgmr.msra.gmra.mrb[36].mxu0 %vm415_vm1, %v1924_v23 }
 0x4b9   : > { %v1893_v14 = vmul.f32 %v3237_v32, %v1875_v24  ;;  %v1759_v34 = vpop.permute.xlu1 %1758 }
 0x4ba   : > { %v1912_v27 = vadd.f32 %v3242_v16, %v1894_v17  ;;  %v1754_v28 = vpop.permute.xlu0 %1753  ;;  %v1774_v54 = vsub.f32 %v3200_v18, %v1759_v34 }
 0x4bb   : > { %v1911_v12 = vadd.f32 %v3242_v16, %v1893_v14 }
 0x4bc   : > { %v1926_v37 = vadd.f32 %v1912_v27, %v3025_v25 }
 0x4bd   : > { %v1925_v1 = vadd.f32 %v1911_v12, %v3016_v20  ;;  %v1831_v36 = vpop.permute.xlu1 %1830 }
 0x4be   : > { %v1878_v40 = vmul.f32 %v1831_v36, %v1766_v35  ;;  %v1826_v42 = vpop.permute.xlu0 %1825 }
 0x4bf   : > { %v1877_v60 = vmul.f32 %v1826_v42, %v1765_v15  ;;  %2642 = vmatprep.mubr.msk.f32.mxu0 %vm415_vm1, %v1925_v1 }
 0x4c0   : > { %v1896_v13 = vmul.f32 %v3237_v32, %v1878_v40  ;;  %2643 = vmatmul.mubr.msk.f32.gmra.mrb[38].mxu0 %vm415_vm1, %v1926_v37 }
 0x4c1   : > { %v1895_v52 = vmul.f32 %v3237_v32, %v1877_v60  ;;  %v1841_v45 = vpop.permute.xlu1 %1840 }
 0x4c2   : > { %v1914_v20 = vadd.f32 %v3242_v16, %v1896_v13  ;;  %v1880_v46 = vmul.f32 %v1841_v45, %v1768_v10  ;;  %v1836_v25 = vpop.permute.xlu0 %1835 }
 0x4c3   : > { %v1913_v62 = vadd.f32 %v3242_v16, %v1895_v52  ;;  %v1879_v4 = vmul.f32 %v1836_v25, %v1767_v3 }
 0x4c4   : > { %v1898_v63 = vmul.f32 %v3237_v32, %v1880_v46  ;;  %v1928_v43 = vadd.f32 %v1914_v20, %v3043_v38 }
 0x4c5   : > { %v1927_v48 = vadd.f32 %v1913_v62, %v3034_v30  ;;  %v1897_v44 = vmul.f32 %v3237_v32, %v1879_v4  ;;  %v1851_v6 = vpop.permute.xlu1 %1850  ;;  %v1771_v30 = vsub.f32 %v3188_v2, %v3249_v21 }
 0x4c6   : > { %v1916_v19 = vadd.f32 %v3242_v16, %v1898_v63  ;;  %v1882_v7 = vmul.f32 %v1851_v6, %v1770_v33  ;;  %v1846_v61 = vpop.permute.xlu0 %1845 }
 0x4c7   : > { %v1915_v47 = vadd.f32 %v3242_v16, %v1897_v44  ;;  %v1881_v41 = vmul.f32 %v1846_v61, %v1769_v9  ;;  %2645 = vmatprep.mubr.msk.f32.mxu0 %vm415_vm1, %v1927_v48 }
 0x4c8   : > { %v1900_v55 = vmul.f32 %v3237_v32, %v1882_v7  ;;  %2646 = vmatmul.mubr.msk.f32.gmra.mrb[40].mxu0 %vm415_vm1, %v1928_v43  ;;  %v1930_v22 = vadd.f32 %v1916_v19, %v3058_v49 }
 0x4c9   : > { %v1929_v38 = vadd.f32 %v1915_v47, %v3046_v39  ;;  %v1899_v26 = vmul.f32 %v3237_v32, %v1881_v41  ;;  %v1861_v57 = vpop.permute.xlu1 %1860  ;;  %v1773_v39 = vsub.f32 %v3204_v31, %v1754_v28 }
 0x4ca   : > { %v1918_v51 = vadd.f32 %v3242_v16, %v1900_v55  ;;  %v1884_v23 = vmul.f32 %v1861_v57, %v1772_v53  ;;  %v1856_v29 = vpop.permute.xlu0 %1855 }
 0x4cb   : > { %v1917_v0 = vadd.f32 %v3242_v16, %v1899_v26  ;;  %v1883_v56 = vmul.f32 %v1856_v29, %v1771_v30  ;;  %2648 = vmatprep.mubr.msk.f32.mxu0 %vm415_vm1, %v1929_v38 }
 0x4cc   : > { %v1902_v2 = vmul.f32 %v3237_v32, %v1884_v23  ;;  %2649 = vmatmul.mubr.msk.f32.gmra.mrb[42].mxu0 %vm415_vm1, %v1930_v22  ;;  %v1932_v17 = vadd.f32 %v1918_v51, %v3073_v58 }
 0x4cd   : > { %v1931_v21 = vadd.f32 %v1917_v0, %v3061_v50  ;;  %v1901_v49 = vmul.f32 %v3237_v32, %v1883_v56  ;;  %v1871_v24 = vpop.permute.xlu1 %1870 }
 0x4ce   : > { %v1920_v14 = vadd.f32 %v3242_v16, %v1902_v2  ;;  %v1886_v27 = vmul.f32 %v1871_v24, %v1774_v54  ;;  %v1866_v12 = vpop.permute.xlu0 %1865 }
 0x4cf   : > { %v1919_v35 = vadd.f32 %v3242_v16, %v1901_v49  ;;  %v1885_v18 = vmul.f32 %v1866_v12, %v1773_v39  ;;  %2651 = vmatprep.mubr.msk.f32.mxu0 %vm415_vm1, %v1931_v21 }
 0x4d0   : > { %v1904_v34 = vmul.f32 %v3237_v32, %v1886_v27  ;;  %2652 = vmatmul.mubr.msk.f32.gmra.mrb[44].mxu0 %vm415_vm1, %v1932_v17  ;;  %v1934_v58 = vadd.f32 %v1920_v14, %v3086_v5 }
 0x4d1   : > { %v1933_v50 = vadd.f32 %v1919_v35, %v3076_v59  ;;  %v1903_v31 = vmul.f32 %v3237_v32, %v1885_v18  ;;  %v2286_v59 = vld [vmem:[%s3361_s2 + $0x6] ss:$0 sm:$0xff] }
 0x4d2   : > { %v1922_v28 = vadd.f32 %v3242_v16, %v1904_v34 }
 0x4d3   : > { %v1921_v15 = vadd.f32 %v3242_v16, %v1903_v31  ;;  %2654 = vmatprep.mubr.msk.f32.mxu0 %vm415_vm1, %v1933_v50 }
 0x4d4   : > { %2655 = vmatmul.mubr.msk.f32.gmra.mrb[46].mxu0 %vm415_vm1, %v1934_v58  ;;  %v1936_v36 = vadd.f32 %v1922_v28, %v3097_v11 }
 0x4d5   : > { %v1935_v1 = vadd.f32 %v1921_v15, %v3089_v8 }
 0x4d7   : > { %2657 = vmatprep.mubr.msk.f32.mxu0 %vm415_vm1, %v1935_v1 }
 0x4d8   : > { %2658 = vmatmul.mubr.msk.f32.gmra.mrb[48].mxu0 %vm415_vm1, %v1936_v36 }
 0x58b   : > { %v2641_v5 = vpop.f32.mrb[36].mxu0 }
 0x58c   : > { %v2055_v8 = vadd.f32 %v2641_v5, %v2286_v59  ;;  %v2049_v11 = vpop.f32.mrb[37].mxu0 }
 0x58d   : > { %v2050_v32 = vadd.f32 %v2286_v59, %v2049_v11 }
 0x58e   : > { %2120 = vst.msk [vmem:[%s3326_s4 + $0x8] sm:$0xff] %vm2118_vm2, %v2055_v8 }
 0x58f   : > { %2119 = vst.msk [vmem:[%s3326_s4] sm:$0xff] %vm2118_vm2, %v2050_v32 }
 0x593   : > { %v2644_v16 = vpop.f32.mrb[38].mxu0 }
 0x594   : > { %v2065_v37 = vadd.f32 %v2644_v16, %v2286_v59  ;;  %v2059_v40 = vpop.f32.mrb[39].mxu0 }
 0x595   : > { %v2060_v42 = vadd.f32 %v2286_v59, %v2059_v40 }
 0x596   : > { %2122 = vst.msk [vmem:[%s3326_s4 + $0x18] sm:$0xff] %vm2118_vm2, %v2065_v37 }
 0x597   : > { %2121 = vst.msk [vmem:[%s3326_s4 + $0x10] sm:$0xff] %vm2118_vm2, %v2060_v42 }
 0x59b   : > { %v2647_v60 = vpop.f32.mrb[40].mxu0 }
 0x59c   : > { %v2075_v10 = vadd.f32 %v2647_v60, %v2286_v59  ;;  %v2069_v13 = vpop.f32.mrb[41].mxu0 }
 0x59d   : > { %v2070_v3 = vadd.f32 %v2286_v59, %v2069_v13 }
 0x59e   : > { %2124 = vst.msk [vmem:[%s3326_s4 + $0x28] sm:$0xff] %vm2118_vm2, %v2075_v10 }
 0x59f   : > { %2123 = vst.msk [vmem:[%s3326_s4 + $0x20] sm:$0xff] %vm2118_vm2, %v2070_v3  ;;  %v2650_v52 = vpop.f32.mrb[42].mxu0 }
 0x5a0   : > { %v2085_v45 = vadd.f32 %v2650_v52, %v2286_v59  ;;  %v2079_v20 = vpop.f32.mrb[43].mxu0 }
 0x5a1   : > { %v2080_v46 = vadd.f32 %v2286_v59, %v2079_v20 }
 0x5a2   : > { %2126 = vst.msk [vmem:[%s3326_s4 + $0x38] sm:$0xff] %vm2118_vm2, %v2085_v45 }
 0x5a3   : > { %2125 = vst.msk [vmem:[%s3326_s4 + $0x30] sm:$0xff] %vm2118_vm2, %v2080_v46  ;;  %v2653_v25 = vpop.f32.mrb[44].mxu0 }
 0x5a4   : > { %v2095_v62 = vadd.f32 %v2653_v25, %v2286_v59  ;;  %v2089_v4 = vpop.f32.mrb[45].mxu0 }
 0x5a5   : > { %v2090_v33 = vadd.f32 %v2286_v59, %v2089_v4 }
 0x5a6   : > { %2128 = vst.msk [vmem:[%s3326_s4 + $0x48] sm:$0xff] %vm2118_vm2, %v2095_v62 }
 0x5a7   : > { %2127 = vst.msk [vmem:[%s3326_s4 + $0x40] sm:$0xff] %vm2118_vm2, %v2090_v33  ;;  %v2656_v63 = vpop.f32.mrb[46].mxu0 }
 0x5a8   : > { %v2105_v9 = vadd.f32 %v2656_v63, %v2286_v59  ;;  %v2099_v48 = vpop.f32.mrb[47].mxu0 }
 0x5a9   : > { %v2100_v44 = vadd.f32 %v2286_v59, %v2099_v48 }
 0x5aa   : > { %2130 = vst.msk [vmem:[%s3326_s4 + $0x58] sm:$0xff] %vm2118_vm2, %v2105_v9 }
 0x5ab   : > { %2129 = vst.msk [vmem:[%s3326_s4 + $0x50] sm:$0xff] %vm2118_vm2, %v2100_v44  ;;  %v2659_v6 = vpop.f32.mrb[48].mxu0 }
 0x5ac   : > { %v2115_v43 = vadd.f32 %v2659_v6, %v2286_v59  ;;  %v2109_v19 = vpop.f32.mrb[49].mxu0 }
 0x5ad   : > { %v2110_v7 = vadd.f32 %v2286_v59, %v2109_v19 }
 0x5ae   : > { %2132 = vst.msk [vmem:[%s3326_s4 + $0x68] sm:$0xff] %vm2118_vm2, %v2115_v43 }
 0x5af   : > { %2131 = vst.msk [vmem:[%s3326_s4 + $0x60] sm:$0xff] %vm2118_vm2, %v2110_v7 }
 0x5b0 PF: > { %s13_s12 = sadd.s32 1, %s2772_s12  }
 0x5b1   : > { %p10_p4 = scmp.ge.s32.totalorder %s13_s12, 4  }
 0x5b3   :  { %12 = sbr.rel (!%p10_p4) target bundleno = 1 (0x1), region = 62 }

</bundles_post_ra>
